<compile_context>
chip_gen: v6e
topology: v6e:2x2x1
jax: 0.10.0
libtpu: 0.0.40
codegen_flags: <defaults>
</compile_context>

<pallas_src>
import jax
import jax.numpy as jnp
from jax.experimental import pallas as pl
from jax.experimental.pallas import tpu as pltpu

# Batch rows folded into the lane/K dimension.  Chosen so PACK * d_in == 128
# (one full vreg lane width; also exactly the v5e MXU contraction width).
PACK = 16


# ----------------------------- Pallas kernel -------------------------------

def packed_mlp_kernel(x_ref, w1_ref, b1_ref, w2_ref, b2_ref, w3_ref, b3_ref,
                      o_ref):
    """MLP forward on one batch tile, with PACK rows folded into the lane axis.

      x_ref : (tile_r, PACK*d_in)   -- PACK original rows per packed row
      w*_ref: block-diagonal replicated weights (bf16), b*_ref: tiled biases (f32)
      o_ref : (tile_r, PACK*d_out)
    """
    x = x_ref[...].astype(jnp.bfloat16)

    h = jnp.dot(x, w1_ref[...], preferred_element_type=jnp.float32)
    h = jnp.maximum(h + b1_ref[...], 0.0)

    h = jnp.dot(h.astype(jnp.bfloat16), w2_ref[...],
                preferred_element_type=jnp.float32)
    h = jnp.maximum(h + b2_ref[...], 0.0)

    out = jnp.dot(h.astype(jnp.bfloat16), w3_ref[...],
                  preferred_element_type=jnp.float32)
    o_ref[...] = (out + b3_ref[...]).astype(o_ref.dtype)


def mlp_backbone(x, packed_params, *, tile_b=8192):
    """Batch-tiled pallas_call over lane-packed rows.

    Weights stay VMEM-resident across grid steps (constant index maps); the
    packed x and output blocks are double-buffered by the BlockSpec pipeline.
    No pad-to-tile: the grid uses pl.cdiv and Pallas masks the partial block.
    """
    w1b, b1b, w2b, b2b, w3b, b3b = packed_params
    batch, d_in = x.shape
    d_out = w3b.shape[1] // PACK

    # Tiny pad (< PACK rows) only when batch is not a multiple of PACK; padded
    # rows give garbage outputs that are sliced off below (no cross-row reduce).
    rem = batch % PACK
    if rem:
        x = jnp.pad(x, ((0, PACK - rem), (0, 0)))
    batch_p = x.shape[0]
    rows = batch_p // PACK

    # Free, contiguous reshape: fold PACK rows into the lane dimension.
    x_packed = x.reshape(rows, PACK * d_in)

    # Packed rows per grid step.  Keep the sublane (2nd-to-last) block dim a
    # multiple of 8, or the full extent when everything fits in one block
    # (a full-extent block dim is always legal).
    tile_r = max(8, (min(tile_b, batch_p) // PACK) // 8 * 8)
    if tile_r >= rows:
        tile_r = rows
    grid = (pl.cdiv(rows, tile_r),)

    def resident(arr):
        # Same block every grid step -> loaded once, kept in VMEM.
        return pl.BlockSpec(arr.shape, lambda i: (0, 0))

    out_packed = pl.pallas_call(
        packed_mlp_kernel,
        out_shape=jax.ShapeDtypeStruct((rows, PACK * d_out), jnp.float32),
        grid_spec=pltpu.PrefetchScalarGridSpec(
            num_scalar_prefetch=0,
            grid=grid,
            in_specs=[
                pl.BlockSpec((tile_r, PACK * d_in), lambda i: (i, 0)),
                resident(w1b), resident(b1b),
                resident(w2b), resident(b2b),
                resident(w3b), resident(b3b),
            ],
            out_specs=pl.BlockSpec((tile_r, PACK * d_out), lambda i: (i, 0)),
        ),
        compiler_params=pltpu.CompilerParams(
            dimension_semantics=("parallel",),
            vmem_limit_bytes=32 * 1024 * 1024,
        ),
    )(x_packed, w1b, b1b, w2b, b2b, w3b, b3b)

    # (rows, PACK*d_out) -> (batch_p, d_out): another free, contiguous reshape.
    out = out_packed.reshape(batch_p, d_out)
    return out[:batch] if batch_p != batch else out


# ------------------------------ Model wrapper -------------------------------

class PallasModel:
    """JAX/Pallas equivalent of tabmoe Model (num_embeddings=None, MLP backbone)."""

    def __init__(self, *, n_num_features, n_cat_features, n_bin_features,
                 d_hidden, d_out, key):
        self.n_num_features = n_num_features
        self.d_num = n_num_features          # num_embeddings is None
        self.d_cat = n_cat_features
        self.d_bin = n_bin_features
        self.d_in = self.d_num + self.d_cat + self.d_bin
        self.d_out = d_out
        assert self.d_in > 0

        k1, k2, k3, k4, k5, k6 = jax.random.split(key, 6)

        def linear_init(kw, kb, fan_in, fan_out):
            # PyTorch nn.Linear default: U(-1/sqrt(fan_in), 1/sqrt(fan_in))
            bound = 1.0 / (fan_in ** 0.5)
            w = jax.random.uniform(kw, (fan_in, fan_out), jnp.float32,
                                   -bound, bound)
            b = jax.random.uniform(kb, (1, fan_out), jnp.float32, -bound, bound)
            return w, b

        w1, b1 = linear_init(k1, k2, self.d_in, d_hidden)
        w2, b2 = linear_init(k3, k4, d_hidden, d_hidden)
        w3, b3 = linear_init(k5, k6, d_hidden, d_out)
        self.plain_params = (w1, b1, w2, b2, w3, b3)

        # Block-diagonal replication: PACK independent copies of each Linear so
        # PACK batch rows travel together along the lane/K dimension.
        # Weights in bf16 (f32 accumulation in-kernel), biases in f32.
        # NOTE: bf16 weights deviate from the f32 PyTorch Linear at ~1e-2 level
        # (matches the module's AMP behavior, not a bit-exact port).
        def block_diag(w):
            return jnp.kron(jnp.eye(PACK, dtype=w.dtype), w)   # (PACK*in, PACK*out)

        def tile_bias(b):
            return jnp.tile(b, (1, PACK))                       # (1, PACK*out)

        self.packed_params = (
            block_diag(w1).astype(jnp.bfloat16), tile_bias(b1),
            block_diag(w2).astype(jnp.bfloat16), tile_bias(b2),
            block_diag(w3).astype(jnp.bfloat16), tile_bias(b3),
        )

    def forward(self, x, *, tile_b=8192):
        # Model.forward splits x into numeric / other features; with
        # num_module=None the split + concat is an identity, so pass x through
        # directly (avoids an extra HBM round trip).
        return mlp_backbone(x, self.packed_params, tile_b=tile_b)

    def __call__(self, x, *, tile_b=8192):
        return self.forward(x, tile_b=tile_b)


# --------------------------------- main -------------------------------------

if __name__ == "__main__":
    key = jax.random.PRNGKey(0)
    k_param, k_x = jax.random.split(key)

    batch = 200                               # not a multiple of 16: exercises the
    n_num, n_cat, n_bin = 4, 3, 1             # tiny pad + partial-block paths
    d_hidden, d_out = 32, 1                   # regression -> d_out = 1

    model = PallasModel(n_num_features=n_num, n_cat_features=n_cat,
                        n_bin_features=n_bin, d_hidden=d_hidden,
                        d_out=d_out, key=k_param)

    x = jax.random.normal(k_x, (batch, n_num + n_cat + n_bin), jnp.float32)

    # Small tile so the grid has >1 step even at this tiny batch.
    out = model(x, tile_b=256)
    out = jax.block_until_ready(out)

    # Pure-JAX reference with identical dtypes (bf16 operands, f32 accumulation).
    w1, b1, w2, b2, w3, b3 = model.plain_params
    xb = x.astype(jnp.bfloat16)
    h = jnp.maximum(jnp.dot(xb, w1.astype(jnp.bfloat16),
                            preferred_element_type=jnp.float32) + b1, 0.0)
    h = jnp.maximum(jnp.dot(h.astype(jnp.bfloat16), w2.astype(jnp.bfloat16),
                            preferred_element_type=jnp.float32) + b2, 0.0)
    ref = jnp.dot(h.astype(jnp.bfloat16), w3.astype(jnp.bfloat16),
                  preferred_element_type=jnp.float32) + b3

    assert out.shape == (batch, d_out)
    assert jnp.allclose(out, ref, atol=1e-2, rtol=1e-2)

    print("KERNEL_OK")
</pallas_src>

<mosaic_0001>
module attributes {stable_mosaic.version = 11 : i64} {
  func.func @packed_mlp_kernel(%arg0: i32, %arg1: memref<8x128xf32, #tpu.memory_space<vmem>>, %arg2: memref<128x512xbf16, #tpu.memory_space<vmem>>, %arg3: memref<1x512xf32, #tpu.memory_space<vmem>>, %arg4: memref<512x512xbf16, #tpu.memory_space<vmem>>, %arg5: memref<1x512xf32, #tpu.memory_space<vmem>>, %arg6: memref<512x16xbf16, #tpu.memory_space<vmem>>, %arg7: memref<1x16xf32, #tpu.memory_space<vmem>>, %arg8: memref<8x16xf32, #tpu.memory_space<vmem>>) attributes {dimension_semantics = [#tpu.dimension_semantics<parallel>], iteration_bounds = array<i64: 2>, scalar_prefetch = 0 : i64, scratch_operands = 0 : i64, tpu.core_type = #tpu.core_type<tc>, window_params = [{transform_indices = @transform_0, window_bounds = array<i64: 8, 128>}, {pipeline_mode = #tpu.pipeline_mode<synchronous>, transform_indices = @transform_1, window_bounds = array<i64: 128, 512>}, {pipeline_mode = #tpu.pipeline_mode<synchronous>, transform_indices = @transform_2, window_bounds = array<i64: 1, 512>}, {pipeline_mode = #tpu.pipeline_mode<synchronous>, transform_indices = @transform_3, window_bounds = array<i64: 512, 512>}, {pipeline_mode = #tpu.pipeline_mode<synchronous>, transform_indices = @transform_4, window_bounds = array<i64: 1, 512>}, {pipeline_mode = #tpu.pipeline_mode<synchronous>, transform_indices = @transform_5, window_bounds = array<i64: 512, 16>}, {pipeline_mode = #tpu.pipeline_mode<synchronous>, transform_indices = @transform_6, window_bounds = array<i64: 1, 16>}, {transform_indices = @transform_7, window_bounds = array<i64: 8, 16>}]} {
    %c0 = arith.constant 0 : index
    %c0_0 = arith.constant 0 : index
    %0 = vector.load %arg1[%c0, %c0_0] : memref<8x128xf32, #tpu.memory_space<vmem>>, vector<8x128xf32>
    %1 = arith.truncf %0 : vector<8x128xf32> to vector<8x128xbf16>
    %c0_1 = arith.constant 0 : index
    %c0_2 = arith.constant 0 : index
    %2 = vector.load %arg2[%c0_1, %c0_2] : memref<128x512xbf16, #tpu.memory_space<vmem>>, vector<128x512xbf16>
    %cst = arith.constant dense<0.000000e+00> : vector<8x512xf32>
    %3 = tpu.matmul %1, %2, %cst {dimension_numbers = #tpu.dot_dimension_numbers<[1], [0], [0], [1], [0, 0, 1, 1], [], []>} : vector<8x128xbf16>, vector<128x512xbf16>, vector<8x512xf32> -> vector<8x512xf32>
    %c0_3 = arith.constant 0 : index
    %c0_4 = arith.constant 0 : index
    %4 = vector.load %arg3[%c0_3, %c0_4] : memref<1x512xf32, #tpu.memory_space<vmem>>, vector<1x512xf32>
    %5 = vector.broadcast %4 : vector<1x512xf32> to vector<8x512xf32>
    %6 = arith.addf %3, %5 : vector<8x512xf32>
    %cst_5 = arith.constant 0.000000e+00 : f32
    %7 = vector.broadcast %cst_5 : f32 to vector<8x512xf32>
    %8 = arith.maximumf %6, %7 : vector<8x512xf32>
    %9 = arith.truncf %8 : vector<8x512xf32> to vector<8x512xbf16>
    %c0_6 = arith.constant 0 : index
    %c0_7 = arith.constant 0 : index
    %10 = vector.load %arg4[%c0_6, %c0_7] : memref<512x512xbf16, #tpu.memory_space<vmem>>, vector<512x512xbf16>
    %cst_8 = arith.constant dense<0.000000e+00> : vector<8x512xf32>
    %11 = tpu.matmul %9, %10, %cst_8 {dimension_numbers = #tpu.dot_dimension_numbers<[1], [0], [0], [1], [0, 0, 1, 1], [], []>} : vector<8x512xbf16>, vector<512x512xbf16>, vector<8x512xf32> -> vector<8x512xf32>
    %c0_9 = arith.constant 0 : index
    %c0_10 = arith.constant 0 : index
    %12 = vector.load %arg5[%c0_9, %c0_10] : memref<1x512xf32, #tpu.memory_space<vmem>>, vector<1x512xf32>
    %13 = vector.broadcast %12 : vector<1x512xf32> to vector<8x512xf32>
    %14 = arith.addf %11, %13 : vector<8x512xf32>
    %cst_11 = arith.constant 0.000000e+00 : f32
    %15 = vector.broadcast %cst_11 : f32 to vector<8x512xf32>
    %16 = arith.maximumf %14, %15 : vector<8x512xf32>
    %17 = arith.truncf %16 : vector<8x512xf32> to vector<8x512xbf16>
    %c0_12 = arith.constant 0 : index
    %c0_13 = arith.constant 0 : index
    %18 = vector.load %arg6[%c0_12, %c0_13] : memref<512x16xbf16, #tpu.memory_space<vmem>>, vector<512x16xbf16>
    %cst_14 = arith.constant dense<0.000000e+00> : vector<8x16xf32>
    %19 = tpu.matmul %17, %18, %cst_14 {dimension_numbers = #tpu.dot_dimension_numbers<[1], [0], [0], [1], [0, 0, 1, 1], [], []>} : vector<8x512xbf16>, vector<512x16xbf16>, vector<8x16xf32> -> vector<8x16xf32>
    %c0_15 = arith.constant 0 : index
    %c0_16 = arith.constant 0 : index
    %20 = vector.load %arg7[%c0_15, %c0_16] : memref<1x16xf32, #tpu.memory_space<vmem>>, vector<1x16xf32>
    %21 = vector.broadcast %20 : vector<1x16xf32> to vector<8x16xf32>
    %22 = arith.addf %19, %21 : vector<8x16xf32>
    %c0_17 = arith.constant 0 : index
    %c0_18 = arith.constant 0 : index
    %23 = vector.load %arg8[%c0_17, %c0_18] : memref<8x16xf32, #tpu.memory_space<vmem>>, vector<8x16xf32>
    tpu.vector_store %arg8[%c0_17, %c0_18], %22 {strides = array<i32>} : memref<8x16xf32, #tpu.memory_space<vmem>>, vector<8x16xf32>,
    return
  }
  func.func @transform_0(%arg0: i32) -> (i32, i32) {
    %c0_i32 = arith.constant 0 : i32
    %c0_i32_0 = arith.constant 0 : i32
    return %arg0, %c0_i32 : i32, i32
  }
  func.func @transform_1(%arg0: i32) -> (i32, i32) {
    %c0_i32 = arith.constant 0 : i32
    %c0_i32_0 = arith.constant 0 : i32
    %c0_i32_1 = arith.constant 0 : i32
    return %c0_i32, %c0_i32_0 : i32, i32
  }
  func.func @transform_2(%arg0: i32) -> (i32, i32) {
    %c0_i32 = arith.constant 0 : i32
    %c0_i32_0 = arith.constant 0 : i32
    %c0_i32_1 = arith.constant 0 : i32
    return %c0_i32, %c0_i32_0 : i32, i32
  }
  func.func @transform_3(%arg0: i32) -> (i32, i32) {
    %c0_i32 = arith.constant 0 : i32
    %c0_i32_0 = arith.constant 0 : i32
    %c0_i32_1 = arith.constant 0 : i32
    return %c0_i32, %c0_i32_0 : i32, i32
  }
  func.func @transform_4(%arg0: i32) -> (i32, i32) {
    %c0_i32 = arith.constant 0 : i32
    %c0_i32_0 = arith.constant 0 : i32
    %c0_i32_1 = arith.constant 0 : i32
    return %c0_i32, %c0_i32_0 : i32, i32
  }
  func.func @transform_5(%arg0: i32) -> (i32, i32) {
    %c0_i32 = arith.constant 0 : i32
    %c0_i32_0 = arith.constant 0 : i32
    %c0_i32_1 = arith.constant 0 : i32
    return %c0_i32, %c0_i32_0 : i32, i32
  }
  func.func @transform_6(%arg0: i32) -> (i32, i32) {
    %c0_i32 = arith.constant 0 : i32
    %c0_i32_0 = arith.constant 0 : i32
    %c0_i32_1 = arith.constant 0 : i32
    return %c0_i32, %c0_i32_0 : i32, i32
  }
  func.func @transform_7(%arg0: i32) -> (i32, i32) {
    %c0_i32 = arith.constant 0 : i32
    %c0_i32_0 = arith.constant 0 : i32
    return %arg0, %c0_i32 : i32, i32
  }
}

</mosaic_0001>

<bundles_post_ra>
// kernel: tpu_custom_call.1
= control target key start
LH: loop header
LB: loop body
LE: loop exit
PB: predicated region body
PF: predicated region fallthrough
CT: control target
= control target key end

     0   :  { %12 = vsyncpa [#allocation3], 0  ;;  %s3041_s0 = inlined_call_operand.vmem [shape: f32[13,128], index: 0, kind: input, shape index: {}]   ;;  %s3042_s1 = inlined_call_operand.vmem [shape: bf16[128,512], index: 1, kind: input, shape index: {}]   ;;  %s3043_s2 = inlined_call_operand.vmem [shape: f32[1,512], index: 2, kind: input, shape index: {}]   ;;  %s3044_s3 = inlined_call_operand.hbm [shape: bf16[512,512], index: 3, kind: input, shape index: {}]   ;;  %s3045_s4 = inlined_call_operand.vmem [shape: f32[1,512], index: 4, kind: input, shape index: {}]   ;;  %s3046_s5 = inlined_call_operand.vmem [shape: bf16[512,16], index: 5, kind: input, shape index: {}]   ;;  %s3047_s6 = inlined_call_operand.vmem [shape: f32[1,16], index: 6, kind: input, shape index: {}]   ;;  %s3048_s7 = inlined_call_operand.hbm [shape: f32[13,16], index: 7, kind: output, shape index: {}]  }
   0x1   :  { %13 = vsyncpa [#allocation4], 0 }
   0x2   :  { %15 = vsyncpa [#allocation4 + $0x1], 0  ;;  %s2699_s24 = smov 0   ;;  %s2701_s25 = smov 0  }
   0x3   :  { %s2703_s26 = smov 0   ;;  %s2705_s27 = smov 0  }
   0x4 LB: > { %s2720_s28 = sadd.s32 4294967295, %s2652_s27   ;;  %s1988_s29 = sadd.s32 4294967294, %s2652_s27   ;;  %s2652_s27 = sphi %s2705_s27, %s3056_s27   ;;  %s2648_s26 = sphi %s2703_s26, %s3055_s26   ;;  %s2644_s25 = sphi %s2701_s25, %s3054_s25   ;;  %s2640_s24 = sphi %s2699_s24, %s3053_s24  }
   0x5   : > { %s2724_s30 = sadd.s32 1, %s2652_s27   ;;  %s180_s8 = sadd.s32 1, %s2648_s26 }
   0x6   : > { %s177_s9 = ssub.s32 %s2652_s27, %s2724_s30  ;;  %p190_p0 = scmp.ne.s32.totalorder %s2648_s26, %s2644_s25 }
   0x7   : > { %p178_p1 = scmp.eq.s32.totalorder %s177_s9, 0  ;;  %p191_p2 = scmp.eq.s32.totalorder %s2720_s28, 1 }
   0x8   : > { %p196_p3 = scmp.ne.s32.totalorder %s2644_s25, %s2640_s24  ;;  %p197_p4 = scmp.eq.s32.totalorder %s1988_s29, 1 }
   0x9   : > { %s2735_s10 = scalar_select %p178_p1, %s2648_s26, %s180_s8  }
   0xa   : > { %p2737_p5 = por %p191_p2, %p190_p0  ;;  %p2741_p6 = por %p197_p4, %p196_p3 }
   0xb   : > { %p1989_p7 = scmp.ge.s32.totalorder %s2652_s27, 1  ;;  %p204_p8 = scmp.lt.s32.totalorder %s2652_s27, 3 }
   0xc   : > { %s3050_s12 = scalar_select %p2741_p6, 1, 0 }
   0xd   : > { %p2251_p9 = scmp.eq.s32.totalorder %s2720_s28, 0  ;;  %p2748_p10 = pnand %p1989_p7, %p204_p8 }
   0xe   : > { %s2654_s14 = smov [#allocation2]  }
   0xf   : > { %s222_s15 = sshll.u32 %s2654_s14, 4  ;;  %p2243_p11 = pneg %p2748_p10  ;;  %s223_s15 = int_to_ptr.vmem [resolvable:$true] %s222_s15 }
  0x10   : > { %s2573_s16 = scalar_lea.vmem %s223_s15, 16384  ;;  %p2581_p3 = scmp.lt.s32.totalorder %s223_s15, %s223_s15 }
  0x11   : > { %p2244_p12 = pnand %p2251_p9, %p2243_p11  ;;  %p2574_p0 = scmp.ne.s32.totalorder %s223_s15, %s2573_s16 }
  0x12   : > { %p2582_p4 = scmp.lt.s32.totalorder %s2573_s16, %s2573_s16 }
  0x13   : > { %p2564_p13 = pneg %p2244_p12 }
  0x14   : > { %p2583_p6 = por %p2582_p4, %p2581_p3 }
  0x15   : > { %p2576_p1 = pnand %p2574_p0, %p2564_p13 }
  0x17   : > { %p2577_p2 = pneg %p2576_p1 }
  0x19   : > { %p2584_p7 = pnand %p2583_p6, %p2577_p2 }
  0x1b   : > { %2587 = shalt.err (!%p2584_p7)
}
  0x1c   : > { %s2655_s17 = smov 256   ;;  %s2656_s18 = smov 16  }
  0x1d   : > { %2246 = dma.hbm_to_vmem [thread:$0]  (!%p2244_p12), %s3044_s3, 16384, %s223_s15, [#allocation3], %s2655_s17, %s2655_s17, %s2656_s18  }
  0x1e   : > { %254 = sbr.rel (%p2748_p10) target bundleno = 752 (0x2f0), region = 48 }
  0x23   : > { %2631 = dma.done.wait (%p2251_p9), [#allocation3], 16384  }
  0x24   : > { %2633 = vsyncadd (%p2251_p9), [#allocation3], 4294950912  ;;  %v2657_v0 = vmov 0   ;;  %v2290_v1 = vld [vmem:[%s3042_s1 + $0xe4] ss:$16 sps:$4 sm:$0xff]   ;;  %p285_p6 = scmp.lt.s32.totalorder %s2720_s28, 1 }
  0x25   : > { %538 = vmatprep.mubr.bf16.mxu0 %v2657_v0  ;;  %579 = vmatprep.mubr.bf16.mxu1 %v2657_v0  ;;  %v2292_v2 = vld [vmem:[%s3042_s1 + $0xec] ss:$16 sps:$4 sm:$0xff]   ;;  %v2294_v3 = vld [vmem:[%s3042_s1 + $0xe0] ss:$16 sps:$4 sm:$0xff]   ;;  %v2295_v4 = vld [vmem:[%s3042_s1 + $0xe8] ss:$16 sps:$4 sm:$0xff]  }
  0x26   : > { %506 = vmatprep.subr.bf16.mxu0 %v2290_v1  ;;  %547 = vmatprep.subr.bf16.mxu1 %v2292_v2  ;;  %v2296_v5 = vld [vmem:[%s3042_s1 + $0xc4] ss:$16 sps:$4 sm:$0xff]   ;;  %v2298_v6 = vld [vmem:[%s3042_s1 + $0xcc] ss:$16 sps:$4 sm:$0xff]   ;;  %v2300_v7 = vld [vmem:[%s3042_s1 + $0xc0] ss:$16 sps:$4 sm:$0xff]  }
  0x27   : > { %507 = vmatpush1.bf16.msra.mxu0 %v2294_v3  ;;  %548 = vmatpush1.bf16.msra.mxu1 %v2295_v4  ;;  %v2301_v8 = vld [vmem:[%s3042_s1 + $0xc8] ss:$16 sps:$4 sm:$0xff]   ;;  %v2302_v9 = vld [vmem:[%s3042_s1 + $0xa4] ss:$16 sps:$4 sm:$0xff]   ;;  %v2304_v10 = vld [vmem:[%s3042_s1 + $0xac] ss:$16 sps:$4 sm:$0xff]  }
  0x28   : > { %508 = vmatprep.subr.bf16.mxu0 %v2296_v5  ;;  %549 = vmatprep.subr.bf16.mxu1 %v2298_v6  ;;  %v2306_v11 = vld [vmem:[%s3042_s1 + $0xa0] ss:$16 sps:$4 sm:$0xff]   ;;  %v2307_v12 = vld [vmem:[%s3042_s1 + $0xa8] ss:$16 sps:$4 sm:$0xff]   ;;  %v2308_v13 = vld [vmem:[%s3042_s1 + $0x84] ss:$16 sps:$4 sm:$0xff]  }
  0x29   : > { %v2310_v14 = vld [vmem:[%s3042_s1 + $0x8c] ss:$16 sps:$4 sm:$0xff]   ;;  %v2312_v15 = vld [vmem:[%s3042_s1 + $0x80] ss:$16 sps:$4 sm:$0xff]   ;;  %v2313_v16 = vld [vmem:[%s3042_s1 + $0x88] ss:$16 sps:$4 sm:$0xff]  }
  0x2a   : > { %v2314_v17 = vld [vmem:[%s3042_s1 + $0x64] ss:$16 sps:$4 sm:$0xff]   ;;  %v2316_v18 = vld [vmem:[%s3042_s1 + $0x6c] ss:$16 sps:$4 sm:$0xff]   ;;  %v2318_v19 = vld [vmem:[%s3042_s1 + $0x60] ss:$16 sps:$4 sm:$0xff]  }
  0x2b   : > { %509 = vmatpush1.bf16.msra.mxu0 %v2300_v7  ;;  %550 = vmatpush1.bf16.msra.mxu1 %v2301_v8  ;;  %v2319_v20 = vld [vmem:[%s3042_s1 + $0x68] ss:$16 sps:$4 sm:$0xff]   ;;  %v2320_v21 = vld [vmem:[%s3042_s1 + $0x44] ss:$16 sps:$4 sm:$0xff]   ;;  %v2322_v22 = vld [vmem:[%s3042_s1 + $0x4c] ss:$16 sps:$4 sm:$0xff]  }
  0x2c   : > { %510 = vmatprep.subr.bf16.mxu0 %v2302_v9  ;;  %551 = vmatprep.subr.bf16.mxu1 %v2304_v10  ;;  %s286_s23 = scalar_select %p285_p6, %s2720_s28, 1  ;;  %v2324_v23 = vld [vmem:[%s3042_s1 + $0x40] ss:$16 sps:$4 sm:$0xff]   ;;  %v2325_v24 = vld [vmem:[%s3042_s1 + $0x48] ss:$16 sps:$4 sm:$0xff]   ;;  %vm1901_vm0 = vcmask 130048  }
  0x2d   : > { %v2326_v25 = vld [vmem:[%s3042_s1 + $0x24] ss:$16 sps:$4 sm:$0xff]   ;;  %v2328_v26 = vld [vmem:[%s3042_s1 + $0x2c] ss:$16 sps:$4 sm:$0xff]   ;;  %v2330_v27 = vld [vmem:[%s3042_s1 + $0x20] ss:$16 sps:$4 sm:$0xff]  }
  0x2e   : > { %s1995_s18 = sshll.u32 %s286_s23, 3  ;;  %v2331_v28 = vld [vmem:[%s3042_s1 + $0x28] ss:$16 sps:$4 sm:$0xff]   ;;  %v2332_v29 = vld [vmem:[%s3042_s1 + $0x4] ss:$16 sps:$4 sm:$0xff]   ;;  %s282_s19 = sand.u32 1, %s2644_s25  }
  0x2f   : > { %511 = vmatpush1.bf16.msra.mxu0 %v2306_v11  ;;  %552 = vmatpush1.bf16.msra.mxu1 %v2307_v12  ;;  %v2334_v30 = vld [vmem:[%s3042_s1 + $0xc] ss:$16 sps:$4 sm:$0xff]   ;;  %s288_s15 = scalar_lea.vmem %s3041_s0, %s1995_s18  ;;  %v2336_v31 = vld [vmem:[%s3042_s1] ss:$16 sps:$4 sm:$0xff]   ;;  %v2337_v32 = vld [vmem:[%s3042_s1 + $0x8] ss:$16 sps:$4 sm:$0xff]  }
  0x30   : > { %512 = vmatprep.subr.bf16.mxu0 %v2308_v13  ;;  %553 = vmatprep.subr.bf16.mxu1 %v2310_v14  ;;  %v290_v33 = vld [vmem:[%s288_s15] sm:$0xff]  ;;  %s1994_s20 = sshll.u32 %s282_s19, 3  ;;  %s2190_s22 = sshll.u32 %s2720_s28, 7 }
  0x31   : > { %v2340_v34 = vld [vmem:[#allocation2 + $0xe4] ss:$16 sps:$4 sm:$0xff]   ;;  %v291_v36 = vpack.c.bf16 %v290_v33, %v290_v33  ;;  %v2338_v37 = vld [vmem:[#allocation2 + $0xe0] ss:$16 sps:$4 sm:$0xff]   ;;  %s284_s29 = scalar_lea.vmem [#allocation5], %s1994_s20  ;;  %s3006_s23 = scalar_lea.hbm %s3048_s7, %s2190_s22 }
  0x32   : > { %v2343_v35 = vld [vmem:[#allocation2 + $0x2e4] ss:$16 sps:$4 sm:$0xff]   ;;  %v2341_v38 = vld [vmem:[#allocation2 + $0x2e0] ss:$16 sps:$4 sm:$0xff]   ;;  %s1917_s8 = sshll.u32 %s284_s29, 4  ;;  %s1904_s14 = scalar_lea.sflag [#allocation4], %s282_s19  ;;  %s1918_s8 = int_to_ptr.vmem [resolvable:$true] %s1917_s8 }
  0x33   : > { %513 = vmatpush1.bf16.msra.mxu0 %v2312_v15  ;;  %554 = vmatpush1.bf16.msra.mxu1 %v2313_v16  ;;  %v2346_v39 = vld [vmem:[#allocation2 + $0xc4] ss:$16 sps:$4 sm:$0xff]   ;;  %v2344_v41 = vld [vmem:[#allocation2 + $0xc0] ss:$16 sps:$4 sm:$0xff]   ;;  %s2588_s15 = scalar_lea.vmem %s1918_s8, 128  ;;  %s2658_s28 = smov [#allocation5]  }
  0x34   : > { %514 = vmatprep.subr.bf16.mxu0 %v2314_v17  ;;  %555 = vmatprep.subr.bf16.mxu1 %v2316_v18  ;;  %v2349_v40 = vld [vmem:[#allocation2 + $0x2c4] ss:$16 sps:$4 sm:$0xff]   ;;  %v2347_v42 = vld [vmem:[#allocation2 + $0x2c0] ss:$16 sps:$4 sm:$0xff]   ;;  %p2589_p8 = scmp.ne.s32.totalorder %s1918_s8, %s2588_s15  ;;  %s2592_s16 = sshll.u32 %s2658_s28, 4  ;;  %s2593_s16 = int_to_ptr.vmem [resolvable:$false] %s2592_s16 }
  0x35   : > { %v2352_v43 = vld [vmem:[#allocation2 + $0xa4] ss:$16 sps:$4 sm:$0xff]   ;;  %v2350_v45 = vld [vmem:[#allocation2 + $0xa0] ss:$16 sps:$4 sm:$0xff]   ;;  %s2594_s17 = scalar_lea.vmem %s2593_s16, 256  ;;  %p2595_p11 = scmp.lt.s32.totalorder %s1918_s8, %s2593_s16 }
  0x36   : > { %v2355_v44 = vld [vmem:[#allocation2 + $0x2a4] ss:$16 sps:$4 sm:$0xff]   ;;  %v2353_v46 = vld [vmem:[#allocation2 + $0x2a0] ss:$16 sps:$4 sm:$0xff]   ;;  %p2590_p9 = pnand %p2589_p8, %p2737_p5  ;;  %p2596_p12 = scmp.lt.s32.totalorder %s2594_s17, %s2588_s15 }
  0x37   : > { %515 = vmatpush1.bf16.msra.mxu0 %v2318_v19  ;;  %556 = vmatpush1.bf16.msra.mxu1 %v2319_v20  ;;  %v2358_v47 = vld [vmem:[#allocation2 + $0x84] ss:$16 sps:$4 sm:$0xff]   ;;  %v2356_v49 = vld [vmem:[#allocation2 + $0x80] ss:$16 sps:$4 sm:$0xff]  }
  0x38   : > { %516 = vmatprep.subr.bf16.mxu0 %v2320_v21  ;;  %557 = vmatprep.subr.bf16.mxu1 %v2322_v22  ;;  %v2361_v48 = vld [vmem:[#allocation2 + $0x284] ss:$16 sps:$4 sm:$0xff]   ;;  %v2359_v50 = vld [vmem:[#allocation2 + $0x280] ss:$16 sps:$4 sm:$0xff]   ;;  %p2591_p10 = pneg %p2590_p9  ;;  %p2597_p13 = por %p2596_p12, %p2595_p11 }
  0x39   : > { %v2364_v51 = vld [vmem:[#allocation2 + $0x64] ss:$16 sps:$4 sm:$0xff]   ;;  %v2362_v53 = vld [vmem:[#allocation2 + $0x60] ss:$16 sps:$4 sm:$0xff]  }
  0x3a   : > { %v2367_v52 = vld [vmem:[#allocation2 + $0x264] ss:$16 sps:$4 sm:$0xff]   ;;  %v2365_v54 = vld [vmem:[#allocation2 + $0x260] ss:$16 sps:$4 sm:$0xff]   ;;  %p2598_p0 = pnand %p2597_p13, %p2591_p10 }
  0x3b   : > { %517 = vmatpush1.bf16.msra.mxu0 %v2324_v23  ;;  %558 = vmatpush1.bf16.msra.mxu1 %v2325_v24  ;;  %v2370_v55 = vld [vmem:[#allocation2 + $0x44] ss:$16 sps:$4 sm:$0xff]   ;;  %v2368_v57 = vld [vmem:[#allocation2 + $0x40] ss:$16 sps:$4 sm:$0xff]  }
  0x3c   : > { %518 = vmatprep.subr.bf16.mxu0 %v2326_v25  ;;  %559 = vmatprep.subr.bf16.mxu1 %v2328_v26  ;;  %v2373_v56 = vld [vmem:[#allocation2 + $0x244] ss:$16 sps:$4 sm:$0xff]   ;;  %v2371_v58 = vld [vmem:[#allocation2 + $0x240] ss:$16 sps:$4 sm:$0xff]  }
  0x3d   : > { %v2376_v59 = vld [vmem:[#allocation2 + $0x24] ss:$16 sps:$4 sm:$0xff]   ;;  %v2374_v61 = vld [vmem:[#allocation2 + $0x20] ss:$16 sps:$4 sm:$0xff]  }
  0x3e   : > { %v2379_v60 = vld [vmem:[#allocation2 + $0x224] ss:$16 sps:$4 sm:$0xff]   ;;  %v2377_v62 = vld [vmem:[#allocation2 + $0x220] ss:$16 sps:$4 sm:$0xff]  }
  0x3f   : > { %519 = vmatpush1.bf16.msra.mxu0 %v2330_v27  ;;  %560 = vmatpush1.bf16.msra.mxu1 %v2331_v28  ;;  %v2382_v63 = vld [vmem:[#allocation2 + $0x4] ss:$16 sps:$4 sm:$0xff]   ;;  %v2380_v1 = vld [vmem:[#allocation2] ss:$16 sps:$4 sm:$0xff]  }
  0x40   : > { %520 = vmatprep.subr.bf16.mxu0 %v2332_v29  ;;  %561 = vmatprep.subr.bf16.mxu1 %v2334_v30  ;;  %v2385_v0 = vld [vmem:[#allocation2 + $0x204] ss:$16 sps:$4 sm:$0xff]   ;;  %v2383_v2 = vld [vmem:[#allocation2 + $0x200] ss:$16 sps:$4 sm:$0xff]  }
  0x41   : > { %v2388_v3 = vld [vmem:[#allocation2 + $0x1e4] ss:$16 sps:$4 sm:$0xff]   ;;  %v2386_v5 = vld [vmem:[#allocation2 + $0x1e0] ss:$16 sps:$4 sm:$0xff]  }
  0x42   : > { %v2391_v4 = vld [vmem:[#allocation2 + $0x3e4] ss:$16 sps:$4 sm:$0xff]   ;;  %v2389_v6 = vld [vmem:[#allocation2 + $0x3e0] ss:$16 sps:$4 sm:$0xff]  }
  0x43   : > { %521 = vmatpush1.bf16.msra.mxu0 %v2336_v31  ;;  %562 = vmatpush1.bf16.msra.mxu1 %v2337_v32  ;;  %v2394_v7 = vld [vmem:[#allocation2 + $0x1c4] ss:$16 sps:$4 sm:$0xff]   ;;  %v2392_v9 = vld [vmem:[#allocation2 + $0x1c0] ss:$16 sps:$4 sm:$0xff]  }
  0x44   : > { %1386 = vmatprep.subr.bf16.mxu0 %v2340_v34  ;;  %1427 = vmatprep.subr.bf16.mxu1 %v2343_v35  ;;  %v2397_v8 = vld [vmem:[#allocation2 + $0x3c4] ss:$16 sps:$4 sm:$0xff]   ;;  %v2395_v10 = vld [vmem:[#allocation2 + $0x3c0] ss:$16 sps:$4 sm:$0xff]   ;;  %v2436_v35 = vld [vmem:[#allocation2 + $0xec] ss:$16 sps:$4 sm:$0xff]  }
  0x45   : > { %v2400_v11 = vld [vmem:[#allocation2 + $0x1a4] ss:$16 sps:$4 sm:$0xff]   ;;  %v2398_v13 = vld [vmem:[#allocation2 + $0x1a0] ss:$16 sps:$4 sm:$0xff]  }
  0x46   : > { %539 = vmatmul.mubr.bf16.vlgmr.msra.gmra.mxu0 %v291_v36  ;;  %580 = vmatmul.mubr.bf16.vlgmr.msra.gmra.mxu1 %v291_v36  ;;  %v2403_v12 = vld [vmem:[#allocation2 + $0x3a4] ss:$16 sps:$4 sm:$0xff]   ;;  %v2401_v14 = vld [vmem:[#allocation2 + $0x3a0] ss:$16 sps:$4 sm:$0xff]   ;;  %v2439_v36 = vld [vmem:[#allocation2 + $0x2ec] ss:$16 sps:$4 sm:$0xff]  }
  0x47   : > { %1387 = vmatpush1.bf16.msra.mxu0 %v2338_v37  ;;  %1428 = vmatpush1.bf16.msra.mxu1 %v2341_v38  ;;  %v2406_v15 = vld [vmem:[#allocation2 + $0x184] ss:$16 sps:$4 sm:$0xff]   ;;  %v2404_v17 = vld [vmem:[#allocation2 + $0x180] ss:$16 sps:$4 sm:$0xff]   ;;  %v326_v37 = vlaneseq }
  0x48   : > { %1388 = vmatprep.subr.bf16.mxu0 %v2346_v39  ;;  %1429 = vmatprep.subr.bf16.mxu1 %v2349_v40  ;;  %v2409_v16 = vld [vmem:[#allocation2 + $0x384] ss:$16 sps:$4 sm:$0xff]   ;;  %v2407_v18 = vld [vmem:[#allocation2 + $0x380] ss:$16 sps:$4 sm:$0xff]  }
  0x49   : > { %v2412_v19 = vld [vmem:[#allocation2 + $0x164] ss:$16 sps:$4 sm:$0xff]   ;;  %v2410_v21 = vld [vmem:[#allocation2 + $0x160] ss:$16 sps:$4 sm:$0xff]   ;;  %v2866_v38 = vshrl.u32 %v326_v37, 7 }
  0x4a   : > { %v2415_v20 = vld [vmem:[#allocation2 + $0x364] ss:$16 sps:$4 sm:$0xff]   ;;  %v2413_v22 = vld [vmem:[#allocation2 + $0x360] ss:$16 sps:$4 sm:$0xff]   ;;  %v2485_v37 = vld [vmem:[#allocation2 + $0x3e8] ss:$16 sps:$4 sm:$0xff]  }
  0x4b   : > { %1389 = vmatpush1.bf16.msra.mxu0 %v2344_v41  ;;  %1430 = vmatpush1.bf16.msra.mxu1 %v2347_v42  ;;  %v2418_v23 = vld [vmem:[#allocation2 + $0x144] ss:$16 sps:$4 sm:$0xff]   ;;  %v2416_v25 = vld [vmem:[#allocation2 + $0x140] ss:$16 sps:$4 sm:$0xff]   ;;  %v328_v39 = vsub.s32 0, %v2866_v38  ;;  %v336_v40 = vsub.s32 2, %v2866_v38 }
  0x4c   : > { %1390 = vmatprep.subr.bf16.mxu0 %v2352_v43  ;;  %1431 = vmatprep.subr.bf16.mxu1 %v2355_v44  ;;  %v2421_v24 = vld [vmem:[#allocation2 + $0x344] ss:$16 sps:$4 sm:$0xff]   ;;  %v2419_v26 = vld [vmem:[#allocation2 + $0x340] ss:$16 sps:$4 sm:$0xff]   ;;  %v332_v42 = vsub.s32 1, %v2866_v38  ;;  %v340_v43 = vsub.s32 3, %v2866_v38 }
  0x4d   : > { %v2424_v27 = vld [vmem:[#allocation2 + $0x124] ss:$16 sps:$4 sm:$0xff]   ;;  %v2422_v29 = vld [vmem:[#allocation2 + $0x120] ss:$16 sps:$4 sm:$0xff]  }
  0x4e   : > { %v2427_v28 = vld [vmem:[#allocation2 + $0x324] ss:$16 sps:$4 sm:$0xff]   ;;  %v2425_v30 = vld [vmem:[#allocation2 + $0x320] ss:$16 sps:$4 sm:$0xff]  }
  0x4f   : > { %1391 = vmatpush1.bf16.msra.mxu0 %v2350_v45  ;;  %1432 = vmatpush1.bf16.msra.mxu1 %v2353_v46  ;;  %v2430_v31 = vld [vmem:[#allocation2 + $0x104] ss:$16 sps:$4 sm:$0xff]   ;;  %v2428_v33 = vld [vmem:[#allocation2 + $0x100] ss:$16 sps:$4 sm:$0xff]  }
  0x50   : > { %1392 = vmatprep.subr.bf16.mxu0 %v2358_v47  ;;  %1433 = vmatprep.subr.bf16.mxu1 %v2361_v48  ;;  %v2433_v32 = vld [vmem:[#allocation2 + $0x304] ss:$16 sps:$4 sm:$0xff]   ;;  %v2431_v34 = vld [vmem:[#allocation2 + $0x300] ss:$16 sps:$4 sm:$0xff]  }
  0x51   : > { %v324_v41 = vld [vmem:[%s3043_s2] sm:$0xf] }
  0x52   : > { %v329_v44 = vrot.slane %v324_v41, %v328_v39  ;;  %v337_v45 = vrot.slane %v324_v41, %v336_v40  ;;  %v333_v46 = vrot.slane %v324_v41, %v332_v42  ;;  %v341_v47 = vrot.slane %v324_v41, %v340_v43  ;;  %v2490_v41 = vld [vmem:[#allocation2 + $0x1cc] ss:$16 sps:$4 sm:$0xff]  }
  0x53   : > { %1393 = vmatpush1.bf16.msra.mxu0 %v2356_v49  ;;  %1434 = vmatpush1.bf16.msra.mxu1 %v2359_v50 }
  0x54   : > { %1394 = vmatprep.subr.bf16.mxu0 %v2364_v51  ;;  %1435 = vmatprep.subr.bf16.mxu1 %v2367_v52 }
  0x57   : > { %1395 = vmatpush1.bf16.msra.mxu0 %v2362_v53  ;;  %1436 = vmatpush1.bf16.msra.mxu1 %v2365_v54 }
  0x58   : > { %1396 = vmatprep.subr.bf16.mxu0 %v2370_v55  ;;  %1437 = vmatprep.subr.bf16.mxu1 %v2373_v56 }
  0x5b   : > { %1397 = vmatpush1.bf16.msra.mxu0 %v2368_v57  ;;  %1438 = vmatpush1.bf16.msra.mxu1 %v2371_v58 }
  0x5c   : > { %1398 = vmatprep.subr.bf16.mxu0 %v2376_v59  ;;  %1439 = vmatprep.subr.bf16.mxu1 %v2379_v60 }
  0x5f   : > { %1399 = vmatpush1.bf16.msra.mxu0 %v2374_v61  ;;  %1440 = vmatpush1.bf16.msra.mxu1 %v2377_v62 }
  0x60   : > { %1400 = vmatprep.subr.bf16.mxu0 %v2382_v63  ;;  %1441 = vmatprep.subr.bf16.mxu1 %v2385_v0 }
  0x63   : > { %1401 = vmatpush1.bf16.msra.mxu0 %v2380_v1  ;;  %1442 = vmatpush1.bf16.msra.mxu1 %v2383_v2 }
  0x64   : > { %1402 = vmatprep.subr.bf16.mxu0 %v2388_v3  ;;  %1443 = vmatprep.subr.bf16.mxu1 %v2391_v4  ;;  %v2434_v3 = vld [vmem:[#allocation2 + $0xe8] ss:$16 sps:$4 sm:$0xff]  }
  0x65   : > { %v2437_v4 = vld [vmem:[#allocation2 + $0x2e8] ss:$16 sps:$4 sm:$0xff]  }
  0x67   : > { %1403 = vmatpush2.bf16.msra.mxu0 %v2386_v5  ;;  %1444 = vmatpush2.bf16.msra.mxu1 %v2389_v6  ;;  %v2442_v6 = vld [vmem:[#allocation2 + $0xcc] ss:$16 sps:$4 sm:$0xff]  }
  0x68   : > { %1404 = vmatprep.subr.bf16.mxu0 %v2394_v7  ;;  %1445 = vmatprep.subr.bf16.mxu1 %v2397_v8  ;;  %v2445_v7 = vld [vmem:[#allocation2 + $0x2cc] ss:$16 sps:$4 sm:$0xff]   ;;  %v2440_v8 = vld [vmem:[#allocation2 + $0xc8] ss:$16 sps:$4 sm:$0xff]  }
  0x6b   : > { %1405 = vmatpush2.bf16.msra.mxu0 %v2392_v9  ;;  %1446 = vmatpush2.bf16.msra.mxu1 %v2395_v10  ;;  %v2443_v9 = vld [vmem:[#allocation2 + $0x2c8] ss:$16 sps:$4 sm:$0xff]   ;;  %v2448_v10 = vld [vmem:[#allocation2 + $0xac] ss:$16 sps:$4 sm:$0xff]  }
  0x6c   : > { %1406 = vmatprep.subr.bf16.mxu0 %v2400_v11  ;;  %1447 = vmatprep.subr.bf16.mxu1 %v2403_v12  ;;  %v2451_v11 = vld [vmem:[#allocation2 + $0x2ac] ss:$16 sps:$4 sm:$0xff]   ;;  %v2446_v12 = vld [vmem:[#allocation2 + $0xa8] ss:$16 sps:$4 sm:$0xff]  }
  0x6f   : > { %1407 = vmatpush2.bf16.msra.mxu0 %v2398_v13  ;;  %1448 = vmatpush2.bf16.msra.mxu1 %v2401_v14  ;;  %v2449_v13 = vld [vmem:[#allocation2 + $0x2a8] ss:$16 sps:$4 sm:$0xff]   ;;  %v2454_v14 = vld [vmem:[#allocation2 + $0x8c] ss:$16 sps:$4 sm:$0xff]  }
  0x70   : > { %1408 = vmatprep.subr.bf16.mxu0 %v2406_v15  ;;  %1449 = vmatprep.subr.bf16.mxu1 %v2409_v16  ;;  %v2457_v15 = vld [vmem:[#allocation2 + $0x28c] ss:$16 sps:$4 sm:$0xff]   ;;  %v2452_v16 = vld [vmem:[#allocation2 + $0x88] ss:$16 sps:$4 sm:$0xff]  }
  0x73   : > { %1409 = vmatpush2.bf16.msra.mxu0 %v2404_v17  ;;  %1450 = vmatpush2.bf16.msra.mxu1 %v2407_v18  ;;  %v2455_v17 = vld [vmem:[#allocation2 + $0x288] ss:$16 sps:$4 sm:$0xff]   ;;  %v2460_v18 = vld [vmem:[#allocation2 + $0x6c] ss:$16 sps:$4 sm:$0xff]  }
  0x74   : > { %1410 = vmatprep.subr.bf16.mxu0 %v2412_v19  ;;  %1451 = vmatprep.subr.bf16.mxu1 %v2415_v20  ;;  %v2463_v19 = vld [vmem:[#allocation2 + $0x26c] ss:$16 sps:$4 sm:$0xff]   ;;  %v2458_v20 = vld [vmem:[#allocation2 + $0x68] ss:$16 sps:$4 sm:$0xff]  }
  0x77   : > { %1411 = vmatpush2.bf16.msra.mxu0 %v2410_v21  ;;  %1452 = vmatpush2.bf16.msra.mxu1 %v2413_v22  ;;  %v2461_v21 = vld [vmem:[#allocation2 + $0x268] ss:$16 sps:$4 sm:$0xff]   ;;  %v2466_v22 = vld [vmem:[#allocation2 + $0x4c] ss:$16 sps:$4 sm:$0xff]  }
  0x78   : > { %1412 = vmatprep.subr.bf16.mxu0 %v2418_v23  ;;  %1453 = vmatprep.subr.bf16.mxu1 %v2421_v24  ;;  %v2469_v23 = vld [vmem:[#allocation2 + $0x24c] ss:$16 sps:$4 sm:$0xff]   ;;  %v2464_v24 = vld [vmem:[#allocation2 + $0x48] ss:$16 sps:$4 sm:$0xff]  }
  0x7b   : > { %1413 = vmatpush2.bf16.msra.mxu0 %v2416_v25  ;;  %1454 = vmatpush2.bf16.msra.mxu1 %v2419_v26  ;;  %v2467_v25 = vld [vmem:[#allocation2 + $0x248] ss:$16 sps:$4 sm:$0xff]   ;;  %v2472_v26 = vld [vmem:[#allocation2 + $0x2c] ss:$16 sps:$4 sm:$0xff]  }
  0x7c   : > { %1414 = vmatprep.subr.bf16.mxu0 %v2424_v27  ;;  %1455 = vmatprep.subr.bf16.mxu1 %v2427_v28  ;;  %v2475_v27 = vld [vmem:[#allocation2 + $0x22c] ss:$16 sps:$4 sm:$0xff]   ;;  %v2470_v28 = vld [vmem:[#allocation2 + $0x28] ss:$16 sps:$4 sm:$0xff]  }
  0x7f   : > { %1415 = vmatpush2.bf16.msra.mxu0 %v2422_v29  ;;  %1456 = vmatpush2.bf16.msra.mxu1 %v2425_v30  ;;  %v2473_v29 = vld [vmem:[#allocation2 + $0x228] ss:$16 sps:$4 sm:$0xff]   ;;  %v2478_v30 = vld [vmem:[#allocation2 + $0xc] ss:$16 sps:$4 sm:$0xff]  }
  0x80   : > { %1416 = vmatprep.subr.bf16.mxu0 %v2430_v31  ;;  %1457 = vmatprep.subr.bf16.mxu1 %v2433_v32  ;;  %v2481_v31 = vld [vmem:[#allocation2 + $0x20c] ss:$16 sps:$4 sm:$0xff]   ;;  %v2476_v32 = vld [vmem:[#allocation2 + $0x8] ss:$16 sps:$4 sm:$0xff]  }
  0x83   : > { %1417 = vmatpush2.bf16.msra.mxu0 %v2428_v33  ;;  %1458 = vmatpush2.bf16.msra.mxu1 %v2431_v34  ;;  %v2479_v33 = vld [vmem:[#allocation2 + $0x208] ss:$16 sps:$4 sm:$0xff]   ;;  %v2484_v34 = vld [vmem:[#allocation2 + $0x1ec] ss:$16 sps:$4 sm:$0xff]  }
  0x84   : > { %1468 = vmatprep.subr.bf16.mxu0 %v2436_v35  ;;  %1509 = vmatprep.subr.bf16.mxu1 %v2439_v36  ;;  %v2487_v35 = vld [vmem:[#allocation2 + $0x3ec] ss:$16 sps:$4 sm:$0xff]   ;;  %v2482_v36 = vld [vmem:[#allocation2 + $0x1e8] ss:$16 sps:$4 sm:$0xff]  }
 0x106   : > { %v540_v48 = vpop.f32.mrf.mxu0  ;;  %v581_v49 = vpop.f32.mrf.mxu1 }
 0x107   : > { %v541_v50 = vadd.f32 %v540_v48, %v329_v44  ;;  %v582_v51 = vadd.f32 %v581_v49, %v337_v45  ;;  %v2493_v44 = vld [vmem:[#allocation2 + $0x3cc] ss:$16 sps:$4 sm:$0xff]   ;;  %v2488_v45 = vld [vmem:[#allocation2 + $0x1c8] ss:$16 sps:$4 sm:$0xff]  }
 0x108   : > { %v542_v52 = vpop.f32.mrf.mxu0  ;;  %v583_v53 = vpop.f32.mrf.mxu1  ;;  %v2499_v48 = vld [vmem:[#allocation2 + $0x3ac] ss:$16 sps:$4 sm:$0xff]   ;;  %v2494_v49 = vld [vmem:[#allocation2 + $0x1a8] ss:$16 sps:$4 sm:$0xff]  }
 0x109   : > { %v590_v54 = vmax.f32 %v582_v51, 0.0  ;;  %v543_v55 = vadd.f32 %v542_v52, %v333_v46  ;;  %v584_v56 = vadd.f32 %v583_v53, %v341_v47  ;;  %v588_v57 = vmax.f32 %v541_v50, 0.0  ;;  %v2491_v46 = vld [vmem:[#allocation2 + $0x3c8] ss:$16 sps:$4 sm:$0xff]   ;;  %v2496_v47 = vld [vmem:[#allocation2 + $0x1ac] ss:$16 sps:$4 sm:$0xff]  }
 0x10a   : > { %v544_v58 = vpop.f32.mrf.mxu0  ;;  %v585_v59 = vpop.f32.mrf.mxu1  ;;  %v2497_v50 = vld [vmem:[#allocation2 + $0x3a8] ss:$16 sps:$4 sm:$0xff]   ;;  %v2502_v51 = vld [vmem:[#allocation2 + $0x18c] ss:$16 sps:$4 sm:$0xff]  }
 0x10b   : > { %v589_v60 = vmax.f32 %v543_v55, 0.0  ;;  %v591_v61 = vmax.f32 %v584_v56, 0.0  ;;  %v2883_v62 = vpack.c.bf16 %v590_v54, %v590_v54  ;;  %v2885_v5 = vpack.c.bf16 %v588_v57, %v588_v57  ;;  %v2505_v52 = vld [vmem:[#allocation2 + $0x38c] ss:$16 sps:$4 sm:$0xff]   ;;  %v2500_v53 = vld [vmem:[#allocation2 + $0x188] ss:$16 sps:$4 sm:$0xff]  }
 0x10c   : > { %v545_v63 = vpop.f32.mrf.mxu0  ;;  %v586_v0 = vpop.f32.mrf.mxu1  ;;  %v2503_v54 = vld [vmem:[#allocation2 + $0x388] ss:$16 sps:$4 sm:$0xff]   ;;  %v2508_v55 = vld [vmem:[#allocation2 + $0x16c] ss:$16 sps:$4 sm:$0xff]  }
 0x10d   : > { %v593_v1 = vpack.c.bf16 %v589_v60, %v589_v60  ;;  %v595_v2 = vpack.c.bf16 %v591_v61, %v591_v61  ;;  %v2511_v56 = vld [vmem:[#allocation2 + $0x36c] ss:$16 sps:$4 sm:$0xff]   ;;  %v2506_v57 = vld [vmem:[#allocation2 + $0x168] ss:$16 sps:$4 sm:$0xff]  }
 0x10e   : > { %v2509_v58 = vld [vmem:[#allocation2 + $0x368] ss:$16 sps:$4 sm:$0xff]   ;;  %v2514_v59 = vld [vmem:[#allocation2 + $0x14c] ss:$16 sps:$4 sm:$0xff]  }
 0x10f   : > { %1418 = vmatprep.mubr.bf16.mxu0 %v593_v1  ;;  %1459 = vmatprep.mubr.bf16.mxu1 %v595_v2  ;;  %v2517_v60 = vld [vmem:[#allocation2 + $0x34c] ss:$16 sps:$4 sm:$0xff]   ;;  %v2512_v61 = vld [vmem:[#allocation2 + $0x148] ss:$16 sps:$4 sm:$0xff]  }
 0x110   : > { %1419 = vmatmul.mubr.bf16.vlgmr.msra.gmra.mxu0 %v2885_v5  ;;  %1460 = vmatmul.mubr.bf16.vlgmr.msra.gmra.mxu1 %v2883_v62  ;;  %v2515_v63 = vld [vmem:[#allocation2 + $0x348] ss:$16 sps:$4 sm:$0xff]   ;;  %v2520_v0 = vld [vmem:[#allocation2 + $0x12c] ss:$16 sps:$4 sm:$0xff]  }
 0x111   : > { %1469 = vmatpush1.bf16.msra.mxu0 %v2434_v3  ;;  %1510 = vmatpush1.bf16.msra.mxu1 %v2437_v4  ;;  %v2521_v3 = vld [vmem:[#allocation2 + $0x328] ss:$16 sps:$4 sm:$0xff]   ;;  %v2526_v4 = vld [vmem:[#allocation2 + $0x10c] ss:$16 sps:$4 sm:$0xff]  }
 0x112   : > { %1500 = vmatprep.mubr.bf16.mxu0 %v593_v1  ;;  %1541 = vmatprep.mubr.bf16.mxu1 %v595_v2  ;;  %v2523_v1 = vld [vmem:[#allocation2 + $0x32c] ss:$16 sps:$4 sm:$0xff]   ;;  %v2518_v2 = vld [vmem:[#allocation2 + $0x128] ss:$16 sps:$4 sm:$0xff]  }
 0x113   : > { %1470 = vmatprep.subr.bf16.mxu0 %v2442_v6  ;;  %1511 = vmatprep.subr.bf16.mxu1 %v2445_v7  ;;  %v2529_v6 = vld [vmem:[#allocation2 + $0x30c] ss:$16 sps:$4 sm:$0xff]   ;;  %v2524_v7 = vld [vmem:[#allocation2 + $0x108] ss:$16 sps:$4 sm:$0xff]  }
 0x115   : > { %1471 = vmatpush1.bf16.msra.mxu0 %v2440_v8  ;;  %1512 = vmatpush1.bf16.msra.mxu1 %v2443_v9  ;;  %v2527_v8 = vld [vmem:[#allocation2 + $0x308] ss:$16 sps:$4 sm:$0xff]  }
 0x116   : > { %1472 = vmatprep.subr.bf16.mxu0 %v2448_v10  ;;  %1513 = vmatprep.subr.bf16.mxu1 %v2451_v11  ;;  %v2530_v9 = vld [vmem:[%s3046_s5 + $0x78] sm:$0xff]   ;;  %v2532_v11 = vld [vmem:[%s3046_s5 + $0x70] sm:$0xff]  }
 0x117   : > { %v2531_v10 = vld [vmem:[%s3046_s5 + $0x38] sm:$0xff]  }
 0x119   : > { %1473 = vmatpush1.bf16.msra.mxu0 %v2446_v12  ;;  %1514 = vmatpush1.bf16.msra.mxu1 %v2449_v13  ;;  %v2533_v12 = vld [vmem:[%s3046_s5 + $0x30] sm:$0xff]   ;;  %v2534_v13 = vld [vmem:[%s3046_s5 + $0x68] sm:$0xff]  }
 0x11a   : > { %1474 = vmatprep.subr.bf16.mxu0 %v2454_v14  ;;  %1515 = vmatprep.subr.bf16.mxu1 %v2457_v15  ;;  %v2535_v14 = vld [vmem:[%s3046_s5 + $0x28] sm:$0xff]   ;;  %v2538_v15 = vld [vmem:[%s3046_s5 + $0x58] sm:$0xff]  }
 0x11d   : > { %1475 = vmatpush1.bf16.msra.mxu0 %v2452_v16  ;;  %1516 = vmatpush1.bf16.msra.mxu1 %v2455_v17  ;;  %v2546_v16 = vld [vmem:[%s3046_s5 + $0xf8] sm:$0xff]  }
 0x11e   : > { %1476 = vmatprep.subr.bf16.mxu0 %v2460_v18  ;;  %1517 = vmatprep.subr.bf16.mxu1 %v2463_v19  ;;  %v2547_v17 = vld [vmem:[%s3046_s5 + $0xb8] sm:$0xff]   ;;  %v2548_v18 = vld [vmem:[%s3046_s5 + $0xf0] sm:$0xff]  }
 0x11f   : > { %v2539_v19 = vld [vmem:[%s3046_s5 + $0x18] sm:$0xff]  }
 0x121   : > { %1477 = vmatpush1.bf16.msra.mxu0 %v2458_v20  ;;  %1518 = vmatpush1.bf16.msra.mxu1 %v2461_v21  ;;  %v2540_v20 = vld [vmem:[%s3046_s5 + $0x50] sm:$0xff]  }
 0x122   : > { %1478 = vmatprep.subr.bf16.mxu0 %v2466_v22  ;;  %1519 = vmatprep.subr.bf16.mxu1 %v2469_v23  ;;  %v2549_v21 = vld [vmem:[%s3046_s5 + $0xb0] sm:$0xff]   ;;  %v2550_v22 = vld [vmem:[%s3046_s5 + $0xe8] sm:$0xff]  }
 0x123   : > { %v2541_v23 = vld [vmem:[%s3046_s5 + $0x10] sm:$0xff]  }
 0x125   : > { %1479 = vmatpush1.bf16.msra.mxu0 %v2464_v24  ;;  %1520 = vmatpush1.bf16.msra.mxu1 %v2467_v25  ;;  %v2542_v24 = vld [vmem:[%s3046_s5 + $0x48] sm:$0xff]  }
 0x126   : > { %1480 = vmatprep.subr.bf16.mxu0 %v2472_v26  ;;  %1521 = vmatprep.subr.bf16.mxu1 %v2475_v27  ;;  %v2551_v25 = vld [vmem:[%s3046_s5 + $0xa8] sm:$0xff]   ;;  %v2552_v26 = vld [vmem:[%s3046_s5 + $0xe0] sm:$0xff]  }
 0x127   : > { %v2543_v27 = vld [vmem:[%s3046_s5 + $0x8] sm:$0xff]  }
 0x129   : > { %1481 = vmatpush1.bf16.msra.mxu0 %v2470_v28  ;;  %1522 = vmatpush1.bf16.msra.mxu1 %v2473_v29  ;;  %v2544_v28 = vld [vmem:[%s3046_s5 + $0x40] sm:$0xff]  }
 0x12a   : > { %1482 = vmatprep.subr.bf16.mxu0 %v2478_v30  ;;  %1523 = vmatprep.subr.bf16.mxu1 %v2481_v31  ;;  %v2553_v29 = vld [vmem:[%s3046_s5 + $0xa0] sm:$0xff]   ;;  %v2554_v30 = vld [vmem:[%s3046_s5 + $0xd8] sm:$0xff]  }
 0x12b   : > { %v2545_v31 = vld [vmem:[%s3046_s5] sm:$0xff]  }
 0x12d   : > { %1483 = vmatpush1.bf16.msra.mxu0 %v2476_v32  ;;  %1524 = vmatpush1.bf16.msra.mxu1 %v2479_v33  ;;  %v2555_v32 = vld [vmem:[%s3046_s5 + $0x98] sm:$0xff]   ;;  %v2556_v33 = vld [vmem:[%s3046_s5 + $0xd0] sm:$0xff]  }
 0x12e   : > { %1484 = vmatprep.subr.bf16.mxu0 %v2484_v34  ;;  %1525 = vmatprep.subr.bf16.mxu1 %v2487_v35  ;;  %v2557_v34 = vld [vmem:[%s3046_s5 + $0x90] sm:$0xff]   ;;  %v2558_v35 = vld [vmem:[%s3046_s5 + $0xc8] sm:$0xff]  }
 0x131   : > { %1485 = vmatpush2.bf16.msra.mxu0 %v2482_v36  ;;  %1526 = vmatpush2.bf16.msra.mxu1 %v2485_v37  ;;  %v2559_v36 = vld [vmem:[%s3046_s5 + $0x88] sm:$0xff]   ;;  %v2560_v37 = vld [vmem:[%s3046_s5 + $0xc0] sm:$0xff]  }
 0x132   : > { %1486 = vmatprep.subr.bf16.mxu0 %v2490_v41  ;;  %1527 = vmatprep.subr.bf16.mxu1 %v2493_v44  ;;  %v2561_v41 = vld [vmem:[%s3046_s5 + $0x80] sm:$0xff]  }
 0x133   : > { %v724_v44 = vld [vmem:[%s3045_s4] sm:$0xf] }
 0x135   : > { %1487 = vmatpush2.bf16.msra.mxu0 %v2488_v45  ;;  %1528 = vmatpush2.bf16.msra.mxu1 %v2491_v46  ;;  %v729_v45 = vrot.slane %v724_v44, %v328_v39  ;;  %v733_v46 = vrot.slane %v724_v44, %v332_v42  ;;  %v737_v39 = vrot.slane %v724_v44, %v336_v40 }
 0x136   : > { %1488 = vmatprep.subr.bf16.mxu0 %v2496_v47  ;;  %1529 = vmatprep.subr.bf16.mxu1 %v2499_v48  ;;  %v741_v42 = vrot.slane %v724_v44, %v340_v43 }
 0x139   : > { %1489 = vmatpush2.bf16.msra.mxu0 %v2494_v49  ;;  %1530 = vmatpush2.bf16.msra.mxu1 %v2497_v50 }
 0x13a   : > { %1490 = vmatprep.subr.bf16.mxu0 %v2502_v51  ;;  %1531 = vmatprep.subr.bf16.mxu1 %v2505_v52 }
 0x13d   : > { %1491 = vmatpush2.bf16.msra.mxu0 %v2500_v53  ;;  %1532 = vmatpush2.bf16.msra.mxu1 %v2503_v54 }
 0x13e   : > { %1492 = vmatprep.subr.bf16.mxu0 %v2508_v55  ;;  %1533 = vmatprep.subr.bf16.mxu1 %v2511_v56 }
 0x141   : > { %1493 = vmatpush2.bf16.msra.mxu0 %v2506_v57  ;;  %1534 = vmatpush2.bf16.msra.mxu1 %v2509_v58 }
 0x142   : > { %1494 = vmatprep.subr.bf16.mxu0 %v2514_v59  ;;  %1535 = vmatprep.subr.bf16.mxu1 %v2517_v60 }
 0x145   : > { %1495 = vmatpush2.bf16.msra.mxu0 %v2512_v61  ;;  %1536 = vmatpush2.bf16.msra.mxu1 %v2515_v63 }
 0x146   : > { %1496 = vmatprep.subr.bf16.mxu0 %v2520_v0  ;;  %1537 = vmatprep.subr.bf16.mxu1 %v2523_v1 }
 0x149   : > { %1497 = vmatpush2.bf16.msra.mxu0 %v2518_v2  ;;  %1538 = vmatpush2.bf16.msra.mxu1 %v2521_v3 }
 0x14a   : > { %1498 = vmatprep.subr.bf16.mxu0 %v2526_v4  ;;  %1539 = vmatprep.subr.bf16.mxu1 %v2529_v6 }
 0x14d   : > { %1499 = vmatpush2.bf16.msra.mxu0 %v2524_v7  ;;  %1540 = vmatpush2.bf16.msra.mxu1 %v2527_v8 }
 0x14e   : > { %2193 = vmatprep.subr.bf16.mxu0 %v2530_v9  ;;  %2215 = vmatprep.subr.bf16.mxu1 %v2546_v16 }
 0x150   : > { %1501 = vmatmul.mubr.bf16.vlgmr.msra.gmra.mxu0 %v2885_v5  ;;  %1542 = vmatmul.mubr.bf16.vlgmr.msra.gmra.mxu1 %v2883_v62  ;;  %v2536_v62 = vld [vmem:[%s3046_s5 + $0x60] sm:$0xff]  }
 0x151   : > { %2194 = vmatpush3.bf16.msra.mxu0 %v2531_v10  ;;  %v2537_v5 = vld [vmem:[%s3046_s5 + $0x20] sm:$0xff]   ;;  %2216 = vmatpush3.bf16.msra.mxu1 %v2547_v17 }
 0x152   : > { %2195 = vmatprep.subr.bf16.mxu0 %v2532_v11  ;;  %2217 = vmatprep.subr.bf16.mxu1 %v2548_v18  ;;  %v2156_v17 = vld [vmem:[%s3047_s6] ss:$0 sm:$0xff] }
 0x155   : > { %2196 = vmatpush3.bf16.msra.mxu0 %v2533_v12  ;;  %2218 = vmatpush3.bf16.msra.mxu1 %v2549_v21 }
 0x156   : > { %2197 = vmatprep.subr.bf16.mxu0 %v2534_v13  ;;  %2219 = vmatprep.subr.bf16.mxu1 %v2550_v22 }
 0x159   : > { %2198 = vmatpush3.bf16.msra.mxu0 %v2535_v14  ;;  %2220 = vmatpush3.bf16.msra.mxu1 %v2551_v25 }
 0x15a   : > { %2199 = vmatprep.subr.bf16.mxu0 %v2536_v62  ;;  %2221 = vmatprep.subr.bf16.mxu1 %v2552_v26 }
 0x15d   : > { %2200 = vmatpush3.bf16.msra.mxu0 %v2537_v5  ;;  %2222 = vmatpush3.bf16.msra.mxu1 %v2553_v29 }
 0x15e   : > { %2201 = vmatprep.subr.bf16.mxu0 %v2538_v15  ;;  %2223 = vmatprep.subr.bf16.mxu1 %v2554_v30 }
 0x161   : > { %2202 = vmatpush3.bf16.msra.mxu0 %v2539_v19  ;;  %2224 = vmatpush3.bf16.msra.mxu1 %v2555_v32 }
 0x162   : > { %2203 = vmatprep.subr.bf16.mxu0 %v2540_v20  ;;  %2225 = vmatprep.subr.bf16.mxu1 %v2556_v33 }
 0x165   : > { %2204 = vmatpush3.bf16.msra.mxu0 %v2541_v23  ;;  %2226 = vmatpush3.bf16.msra.mxu1 %v2557_v34 }
 0x166   : > { %2205 = vmatprep.subr.bf16.mxu0 %v2542_v24  ;;  %2227 = vmatprep.subr.bf16.mxu1 %v2558_v35 }
 0x169   : > { %2206 = vmatpush3.bf16.msra.mxu0 %v2543_v27  ;;  %2228 = vmatpush3.bf16.msra.mxu1 %v2559_v36 }
 0x16a   : > { %2207 = vmatprep.subr.bf16.mxu0 %v2544_v28  ;;  %2229 = vmatprep.subr.bf16.mxu1 %v2560_v37 }
 0x16d   : > { %2208 = vmatpush3.bf16.msra.mxu0 %v2545_v31  ;;  %2230 = vmatpush3.bf16.msra.mxu1 %v2561_v41 }
 0x1d0   : > { %v1420_v47 = vpop.f32.mrf.mxu0  ;;  %v1461_v48 = vpop.f32.mrf.mxu1 }
 0x1d1   : > { %v1421_v49 = vadd.f32 %v1420_v47, %v729_v45 }
 0x1d2   : > { %v1422_v50 = vpop.f32.mrf.mxu0  ;;  %v1463_v51 = vpop.f32.mrf.mxu1 }
 0x1d3   : > { %v1462_v52 = vadd.f32 %v1461_v48, %v1421_v49  ;;  %v1423_v53 = vadd.f32 %v1422_v50, %v733_v46 }
 0x1d4   : > { %v1424_v54 = vpop.f32.mrf.mxu0  ;;  %v1465_v55 = vpop.f32.mrf.mxu1 }
 0x1d5   : > { %v1464_v56 = vadd.f32 %v1463_v51, %v1423_v53  ;;  %v1550_v57 = vmax.f32 %v1462_v52, 0.0 }
 0x1d6   : > { %v1425_v58 = vpop.f32.mrf.mxu0  ;;  %v1466_v59 = vpop.f32.mrf.mxu1 }
 0x1d7   : > { %v1551_v60 = vmax.f32 %v1464_v56, 0.0  ;;  %v1554_v63 = vpack.c.bf16 %v1550_v57, %v1550_v57 }
 0x1d9   : > { %v1555_v61 = vpack.c.bf16 %v1551_v60, %v1551_v60 }
 0x1db   : > { %1853 = vmatprep.mubr.bf16.mxu0 %v1555_v61 }
 0x1dc   : > { %1854 = vmatmul.mubr.bf16.vlgmr.msra.gmra.mxu0 %v1554_v63 }
 0x210   : > { %v1502_v0 = vpop.f32.mrf.mxu0  ;;  %v1543_v1 = vpop.f32.mrf.mxu1 }
 0x211   : > { %v1503_v2 = vadd.f32 %v1502_v0, %v737_v39 }
 0x212   : > { %v1504_v3 = vpop.f32.mrf.mxu0  ;;  %v1545_v4 = vpop.f32.mrf.mxu1 }
 0x213   : > { %v1544_v6 = vadd.f32 %v1543_v1, %v1503_v2  ;;  %v1505_v7 = vadd.f32 %v1504_v3, %v741_v42 }
 0x214   : > { %v1506_v8 = vpop.f32.mrf.mxu0  ;;  %v1547_v9 = vpop.f32.mrf.mxu1 }
 0x215   : > { %v1546_v10 = vadd.f32 %v1545_v4, %v1505_v7  ;;  %v1552_v11 = vmax.f32 %v1544_v6, 0.0 }
 0x216   : > { %v1507_v12 = vpop.f32.mrf.mxu0  ;;  %v1548_v13 = vpop.f32.mrf.mxu1 }
 0x217   : > { %v1553_v14 = vmax.f32 %v1546_v10, 0.0  ;;  %v1556_v62 = vpack.c.bf16 %v1552_v11, %v1552_v11 }
 0x219   : > { %v1557_v40 = vpack.c.bf16 %v1553_v14, %v1553_v14 }
 0x21b   : > { %1893 = vmatprep.mubr.bf16.mxu1 %v1557_v40 }
 0x21c   : > { %1894 = vmatmul.mubr.bf16.vlgmr.msra.gmra.mxu1 %v1556_v62 }
 0x29c   : > { %v2209_v38 = vpop.f32.mrf.mxu0 }
 0x29e   : > { %v2210_v43 = vpop.f32.mrf.mxu0 }
 0x29f   : > { %v2211_v16 = vadd.f32 %v2210_v43, %v2209_v38 }
 0x2a0   : > { %v2212_v5 = vpop.f32.mrf.mxu0 }
 0x2a1   : > { %v1856_v20 = vadd.f32 %v2211_v16, %v2156_v17 }
 0x2a2   : > { %v2213_v15 = vpop.f32.mrf.mxu0 }
 0x2dc   : > { %v2231_v18 = vpop.f32.mrf.mxu1 }
 0x2de   : > { %v2232_v19 = vpop.f32.mrf.mxu1 }
 0x2df   : > { %v2233_v21 = vadd.f32 %v2232_v19, %v2231_v18 }
 0x2e0   : > { %v2234_v22 = vpop.f32.mrf.mxu1 }
 0x2e1   : > { %v1896_v23 = vadd.f32 %v2233_v21, %v1856_v20 }
 0x2e2   : > { %v2235_v24 = vpop.f32.mrf.mxu1 }
 0x2e3   : > { %1902 = vst.msk [vmem:[%s284_s29] sm:$0xff] %vm1901_vm0, %v1896_v23 }
 0x2e4   : > { %2601 = shalt.err (!%p2598_p0)
}
 0x2e5   : > { %s2602_s20 = scalar_lea.hbm %s3006_s23, 128  ;;  %s2606_s21 = scalar_lea.hbm %s3048_s7, 256 }
 0x2e6   : > { %p2603_p1 = scmp.ne.s32.totalorder %s3006_s23, %s2602_s20  ;;  %p2607_p4 = scmp.lt.s32.totalorder %s3006_s23, %s3048_s7 }
 0x2e7   : > { %p2608_p7 = scmp.lt.s32.totalorder %s2606_s21, %s2602_s20 }
 0x2e8   : > { %p2604_p2 = pnand %p2603_p1, %p2737_p5 }
 0x2e9   : > { %p2609_p6 = por %p2608_p7, %p2607_p4 }
 0x2ea   : > { %p2605_p3 = pneg %p2604_p2 }
 0x2ec   : > { %p2610_p8 = pnand %p2609_p6, %p2605_p3 }
 0x2ee   : > { %2613 = shalt.err (!%p2610_p8)
}
 0x2ef   : > { %2241 = dma.vmem_to_hbm [thread:$0]  (%p2737_p5), %s1918_s8, 128, %s3006_s23, %s1904_s14  }
 0x2f0 PF: > { %p2253_p9 = scmp.ge.s32.totalorder %s2652_s27, 2  ;;  %s1929_s9 = sand.u32 1, %s2640_s24  }
 0x2f1   : > { %p3052_p10 = scmp.ne.s32.totalorder %s3050_s12, 0  ;;  %s1930_s13 = scalar_lea.sflag [#allocation4], %s1929_s9 }
 0x2f3   : > { %p2248_p11 = pnand %p2253_p9, %p3052_p10 }
 0x2f5   : > { %p2249_p12 = pneg %p2248_p11 }
 0x2f7   : > { %2635 = dma.done.wait (%p2249_p12), %s1930_s13, 128  }
 0x2f8   : > { %2637 = vsyncadd (%p2249_p12), %s1930_s13, 4294967168  ;;  %p18_p13 = scmp.ge.s32.totalorder %s2724_s30, 4   ;;  %s3053_s24 = smov %s2644_s25 }
 0x2f9   : > { %s3054_s25 = smov %s2648_s26  ;;  %s3055_s26 = smov %s2735_s10 }
 0x2fa   : > { %s3056_s27 = smov %s2724_s30  ;;  %20 = sbr.rel (!%p18_p13) target bundleno = 4 (0x4), region = 88 }
 0x2ff   :  { %1935 = vsyncpa [#allocation3], 1 }
 0x300   :  { %1937 = vsyncpa [#allocation3 + $0x1], 1 }
 0x301   :  { %1938 = vsyncpa [#allocation4], 1 }
 0x302   :  { %1940 = vsyncpa [#allocation4 + $0x1], 1 }

</bundles_post_ra>
